<compile_context>
chip_gen: v7x
topology: tpu7x:2x2x1
jax: 0.10.0
libtpu: 0.0.40
codegen_flags: <defaults>
</compile_context>

<pallas_src>
import jax
import jax.numpy as jnp
from jax import lax
from jax.experimental import pallas as pl
from jax.experimental.pallas import tpu as pltpu


_CHUNK = 128  # lane sub-tile per inner iteration: keeps the live (Hp, _CHUNK)
              # f32 h slab at <= 16 vregs even for Hp = 128 (no vreg spills).


def _round_up(x, m):
    return -(-x // m) * m


def per_feature_kernel(x_ref, w1t_ref, v_ref, o_ref):
    """One grid step = one feature d x one lane tile of TILE_B batch columns.

    x_ref  : (1, K1, TILE_B)  x^T columns for feature d: [ex[b,:,d]; tgt[b,d]; 1]
    w1t_ref: (Hp, K1)         (W1 | b1)^T, zero-padded to Hp sublanes (resident)
    v_ref  : (1, Hp, _CHUNK)  v_d = (Wc @ W2^T)[d], pre-broadcast across lanes
    o_ref  : (1, 1, TILE_B)   s[d, b] = relu(W1^T x_b + b1) . v_d   (lane-dense)
    """
    w1t = w1t_ref[...]                              # tiny, loop-invariant
    n_chunks = x_ref.shape[-1] // _CHUNK            # static

    def chunk(c, carry):
        start = pl.multiple_of(c * _CHUNK, _CHUNK)
        xc = x_ref[0, :, pl.ds(start, _CHUNK)]                      # (K1, C)
        h = jnp.dot(w1t, xc, preferred_element_type=jnp.float32)    # MXU: (Hp, C)
        h = jnp.maximum(h, 0.0)                                     # VPU (bias already in dot)
        p = h * v_ref[0]                                            # VPU, no lane broadcast needed
        o_ref[0, :, pl.ds(start, _CHUNK)] = jnp.sum(p, axis=0, keepdims=True)  # sublane reduce
        return carry

    lax.fori_loop(0, n_chunks, chunk, 0, unroll=True)


def per_feature_model(example_records, record_to_classify, params,
                      *, compute_dtype=jnp.bfloat16, target_cols=2048):
    """example_records: (B, E, D) f32, record_to_classify: (B, D) f32 -> (B,) f32."""
    w1, b1, w2, b2, wc, bc = params
    B, E, D = example_records.shape
    K1 = E + 2                    # example column (E) + target scalar + 1.0 (bias fold)
    H = w1.shape[1]
    F = w2.shape[1]
    Hp = _round_up(H, 8)          # H lives on the sublane axis now
    f32 = jnp.float32

    # ---- fold the classifier Linear(D*F -> 1) into the per-feature weights:
    #      out[b] = sum_d relu([x_{b,d}, 1] @ [W1; b1]) . v_d + const,
    #      v_d = W2 @ wc_d (wc is d-major/f-minor = torch.stack(dim=1).flatten order)
    wc_mat = wc.reshape(D, F).astype(f32)
    vt = wc_mat @ w2.astype(f32).T                                  # (D, H)
    const = jnp.sum(wc_mat @ b2.astype(f32)) + jnp.sum(bc)

    # ---- resident (W1 | b1)^T operand, (Hp, K1); zero rows H..Hp-1 are inert.
    w1_aug = jnp.concatenate([w1.astype(f32), b1.reshape(1, H).astype(f32)], axis=0)  # (K1, H)
    w1t = jnp.zeros((Hp, K1), f32).at[:H, :].set(w1_aug.T).astype(compute_dtype)

    # ---- v_d pre-broadcast across _CHUNK lanes (post-matmul work stays f32).
    v_all = jnp.zeros((D, Hp, 1), f32).at[:, :H, 0].set(vt)
    v_all = jnp.broadcast_to(v_all, (D, Hp, _CHUNK))

    # ---- lane tiling over the batch axis (batch index lives on lanes).
    tile_b = min(_round_up(B, _CHUNK), _round_up(target_cols, _CHUNK))
    if D == 1 and B > _CHUNK:     # keep >= 2 grid steps so both v7x TensorCores work
        tile_b = min(tile_b, _round_up(-(-B // 2), _CHUNK))
    b_pad = _round_up(B, tile_b)
    grid = (D, b_pad // tile_b)

    # ---- one offline permutation to a lane-dense (D, K1, B_pad) layout; the
    # streamed block's last dim is a >=128-lane batch tile, its sublane dim K1
    # is the full array dim.  Zero-padded batch columns are provably inert
    # (ones row also zeroed -> relu(0) = 0) and sliced off below.
    # TODO(synk): fuse this transpose/concat into the kernel's input DMA (read
    # example_records in native (B, E, D) layout) to drop one extra HBM pass.
    ex_t = jnp.transpose(example_records.astype(f32), (2, 1, 0))               # (D, E, B)
    tgt_t = jnp.transpose(record_to_classify.astype(f32), (1, 0))[:, None, :]  # (D, 1, B)
    ones = jnp.ones((D, 1, B), f32)
    xT = jnp.concatenate([ex_t, tgt_t, ones], axis=1)                          # (D, K1, B)
    xT = jnp.pad(xT, ((0, 0), (0, 0), (0, b_pad - B))).astype(compute_dtype)

    s = pl.pallas_call(
        per_feature_kernel,
        out_shape=jax.ShapeDtypeStruct((D, 1, b_pad), jnp.float32),
        grid_spec=pltpu.PrefetchScalarGridSpec(
            num_scalar_prefetch=0,
            grid=grid,
            in_specs=[
                pl.BlockSpec((1, K1, tile_b), lambda d, i: (d, 0, i)),   # x^T: streamed, lane-dense
                pl.BlockSpec((Hp, K1), lambda d, i: (0, 0)),             # (W1|b1)^T: resident
                pl.BlockSpec((1, Hp, _CHUNK), lambda d, i: (d, 0, 0)),   # v_d: changes only with d
            ],
            out_specs=pl.BlockSpec((1, 1, tile_b), lambda d, i: (d, 0, i)),  # lane-dense stores
        ),
        compiler_params=pltpu.CompilerParams(
            dimension_semantics=("parallel", "parallel"),
            vmem_limit_bytes=32 * 1024 * 1024,
        ),
    )(xT, w1t, v_all)

    # tiny final reduction: D per-feature scores per batch element + folded const.
    return jnp.sum(s[:, 0, :B], axis=0) + const              # (B,) == .view(-1)


def reference(example_records, record_to_classify, params):
    """Pure-JAX transcription of the PyTorch forward (per-feature Python loop)."""
    w1, b1, w2, b2, wc, bc = params
    B, E, D = example_records.shape
    tgt = record_to_classify[:, None, :]                      # unsqueeze(dim=1)
    outs = []
    for i in range(D):
        xi = jnp.concatenate([example_records[:, :, i], tgt[:, :, i]], axis=-1)
        h = jax.nn.relu(xi @ w1 + b1)
        outs.append(h @ w2 + b2)                              # (B, F)
    ci = jnp.stack(outs, axis=1).reshape(B, -1)               # (B, D*F)
    return (ci @ wc[:, None] + bc).reshape(-1)


if __name__ == "__main__":
    # Small shapes consistent with the forward:
    B, E, D = 2, 8, 4        # batch, example records per batch, features
    H, F = 32, 8             # singleFeatureModel hidden / output sizes

    key = jax.random.PRNGKey(0)
    k = jax.random.split(key, 8)
    example_records = jax.random.normal(k[0], (B, E, D), dtype=jnp.float32)
    record_to_classify = jax.random.normal(k[1], (B, D), dtype=jnp.float32)

    w1 = jax.random.normal(k[2], (E + 1, H), dtype=jnp.float32) * 0.1
    b1 = jax.random.normal(k[3], (H,), dtype=jnp.float32) * 0.1
    w2 = jax.random.normal(k[4], (H, F), dtype=jnp.float32) * 0.1
    b2 = jax.random.normal(k[5], (F,), dtype=jnp.float32) * 0.1
    wc = jax.random.normal(k[6], (D * F,), dtype=jnp.float32) * 0.1
    bc = jax.random.normal(k[7], (1,), dtype=jnp.float32) * 0.1
    params = (w1, b1, w2, b2, wc, bc)

    ref = reference(example_records, record_to_classify, params)

    # f32 path: faithful to the PyTorch module (tight tolerance).
    out_f32 = jax.block_until_ready(
        per_feature_model(example_records, record_to_classify, params,
                          compute_dtype=jnp.float32))
    assert out_f32.shape == (B,)
    assert jnp.allclose(out_f32, ref, atol=1e-4, rtol=1e-4), (out_f32, ref)

    # bf16-operand path (default): f32 accumulation, looser tolerance.
    out_bf16 = jax.block_until_ready(
        per_feature_model(example_records, record_to_classify, params,
                          compute_dtype=jnp.bfloat16))
    assert out_bf16.shape == (B,)
    assert jnp.allclose(out_bf16, ref, atol=2e-2, rtol=2e-2), (out_bf16, ref)

    print("KERNEL_OK")
</pallas_src>

<mosaic_0001>
module attributes {stable_mosaic.version = 11 : i64} {
  func.func @per_feature_kernel(%arg0: i32, %arg1: i32, %arg2: memref<1x10x128xf32, #tpu.memory_space<vmem>>, %arg3: memref<32x10xf32, #tpu.memory_space<vmem>>, %arg4: memref<1x32x128xf32, #tpu.memory_space<vmem>>, %arg5: memref<1x1x128xf32, #tpu.memory_space<vmem>>) attributes {dimension_semantics = [#tpu.dimension_semantics<parallel>, #tpu.dimension_semantics<parallel>], iteration_bounds = array<i64: 4, 1>, scalar_prefetch = 0 : i64, scratch_operands = 0 : i64, tpu.core_type = #tpu.core_type<tc>, window_params = [{transform_indices = @transform_0, window_bounds = array<i64: 1, 10, 128>}, {pipeline_mode = #tpu.pipeline_mode<synchronous>, transform_indices = @transform_1, window_bounds = array<i64: 32, 10>}, {transform_indices = @transform_2, window_bounds = array<i64: 1, 32, 128>}, {transform_indices = @transform_3, window_bounds = array<i64: 1, 1, 128>}]} {
    %c0 = arith.constant 0 : index
    %c0_0 = arith.constant 0 : index
    %0 = vector.load %arg3[%c0, %c0_0] : memref<32x10xf32, #tpu.memory_space<vmem>>, vector<32x10xf32>
    %c0_i32 = arith.constant 0 : i32
    %c128_i32 = arith.constant 128 : i32
    %1 = arith.muli %c0_i32, %c128_i32 : i32
    %2 = tpu.assume_multiple %1, 128 : i32
    %c0_1 = arith.constant 0 : index
    %c0_2 = arith.constant 0 : index
    %3 = arith.index_cast %2 : i32 to index
    %4 = vector.load %arg2[%c0_1, %c0_2, %3] : memref<1x10x128xf32, #tpu.memory_space<vmem>>, vector<1x10x128xf32>
    %5 = vector.shape_cast %4 : vector<1x10x128xf32> to vector<10x128xf32>
    %cst = arith.constant dense<0.000000e+00> : vector<32x128xf32>
    %6 = tpu.matmul %0, %5, %cst {dimension_numbers = #tpu.dot_dimension_numbers<[1], [0], [0], [1], [0, 0, 1, 1], [], []>} : vector<32x10xf32>, vector<10x128xf32>, vector<32x128xf32> -> vector<32x128xf32>
    %cst_3 = arith.constant 0.000000e+00 : f32
    %7 = vector.broadcast %cst_3 : f32 to vector<32x128xf32>
    %8 = arith.maximumf %6, %7 : vector<32x128xf32>
    %c0_4 = arith.constant 0 : index
    %c0_5 = arith.constant 0 : index
    %c0_6 = arith.constant 0 : index
    %9 = vector.load %arg4[%c0_4, %c0_5, %c0_6] : memref<1x32x128xf32, #tpu.memory_space<vmem>>, vector<1x32x128xf32>
    %10 = vector.shape_cast %9 : vector<1x32x128xf32> to vector<32x128xf32>
    %11 = arith.mulf %8, %10 : vector<32x128xf32>
    %cst_7 = arith.constant dense<0.000000e+00> : vector<128xf32>
    %12 = vector.multi_reduction <add>, %11, %cst_7 [0] : vector<32x128xf32> to vector<128xf32>
    %13 = vector.shape_cast %12 : vector<128xf32> to vector<1x128xf32>
    %c0_8 = arith.constant 0 : index
    %c0_9 = arith.constant 0 : index
    %14 = arith.index_cast %2 : i32 to index
    %15 = vector.load %arg5[%c0_8, %c0_9, %14] : memref<1x1x128xf32, #tpu.memory_space<vmem>>, vector<1x1x128xf32>
    %16 = vector.shape_cast %15 : vector<1x1x128xf32> to vector<1x128xf32>
    %17 = vector.shape_cast %13 : vector<1x128xf32> to vector<1x1x128xf32>
    tpu.vector_store %arg5[%c0_8, %c0_9, %14], %17 {strides = array<i32>} : memref<1x1x128xf32, #tpu.memory_space<vmem>>, vector<1x1x128xf32>,
    %c1_i32 = arith.constant 1 : i32
    return
  }
  func.func @transform_0(%arg0: i32, %arg1: i32) -> (i32, i32, i32) {
    %c0_i32 = arith.constant 0 : i32
    %c0_i32_0 = arith.constant 0 : i32
    return %arg0, %c0_i32, %arg1 : i32, i32, i32
  }
  func.func @transform_1(%arg0: i32, %arg1: i32) -> (i32, i32) {
    %c0_i32 = arith.constant 0 : i32
    %c0_i32_0 = arith.constant 0 : i32
    %c0_i32_1 = arith.constant 0 : i32
    return %c0_i32, %c0_i32_0 : i32, i32
  }
  func.func @transform_2(%arg0: i32, %arg1: i32) -> (i32, i32, i32) {
    %c0_i32 = arith.constant 0 : i32
    %c0_i32_0 = arith.constant 0 : i32
    %c0_i32_1 = arith.constant 0 : i32
    return %arg0, %c0_i32, %c0_i32_0 : i32, i32, i32
  }
  func.func @transform_3(%arg0: i32, %arg1: i32) -> (i32, i32, i32) {
    %c0_i32 = arith.constant 0 : i32
    %c0_i32_0 = arith.constant 0 : i32
    return %arg0, %c0_i32, %arg1 : i32, i32, i32
  }
}

</mosaic_0001>

<bundles_post_ra>
// kernel: tpu_custom_call.1
= control target key start
LH: loop header
LB: loop body
LE: loop exit
PB: predicated region body
PF: predicated region fallthrough
CT: control target
= control target key end

     0   :  { %8 = vsyncpa [#allocation3], 0  ;;  %s771_s0 = inlined_call_operand.vmem [shape: f32[4,10,128], index: 0, kind: input, shape index: {}]   ;;  %s772_s1 = inlined_call_operand.vmem [shape: f32[32,10], index: 1, kind: input, shape index: {}]   ;;  %s773_s2 = inlined_call_operand.vmem [shape: f32[4,32,128], index: 2, kind: input, shape index: {}]   ;;  %s774_s3 = inlined_call_operand.hbm [shape: f32[4,1,128], index: 3, kind: output, shape index: {}]  }
   0x1   :  { %10 = vsyncpa [#allocation3 + $0x1], 0  ;;  %s640_s12 = smov 0   ;;  %s642_s13 = smov 0  }
   0x2   :  { %s644_s14 = smov 0   ;;  %s646_s15 = smov 0  }
   0x3   :  { %s648_s16 = smov 0   ;;  %s650_s17 = smov 0  }
   0x4 LB: > { %s439_s18 = sadd.s32 4294967295, %s616_s17   ;;  %s440_s19 = sadd.s32 4294967294, %s616_s17   ;;  %s616_s17 = sphi %s650_s17, %s16_s17   ;;  %s612_s16 = sphi %s648_s16, %s781_s16   ;;  %s608_s15 = sphi %s646_s15, %s780_s15   ;;  %s604_s14 = sphi %s644_s14, %s779_s14   ;;  %s600_s13 = sphi %s642_s13, %s778_s13   ;;  %s596_s12 = sphi %s640_s12, %s777_s12  }
   0x5   : > { %s28_s20 = sadd.s32 1, %s612_s16  ;;  %s112_s21 = sadd.s32 1, %s604_s14 }
   0x6   : > { %p30_p0 = scmp.ge.s32.totalorder %s28_s20, 4  ;;  %p122_p1 = scmp.ne.s32.totalorder %s604_s14, %s600_s13 }
   0x7   : > { %p123_p2 = scmp.eq.s32.totalorder %s439_s18, 3  ;;  %p128_p3 = scmp.ne.s32.totalorder %s600_s13, %s596_s12 }
   0x8   : > { %s783_s20 = smov (%p30_p0, %s28_s20), 0  ;;  %p129_p5 = scmp.eq.s32.totalorder %s440_s19, 3 }
   0x9   : > { %p680_p4 = por %p123_p2, %p122_p1  ;;  %s107_s23 = ssub.s32 %s612_s16, %s783_s20 }
   0xa   : > { %p443_p6 = scmp.ge.s32.totalorder %s616_s17, 1  ;;  %p110_p7 = scmp.eq.s32.totalorder %s107_s23, 0 }
   0xb   : > { %p687_p8 = por %p129_p5, %p128_p3  ;;  %p169_p9 = scmp.lt.s32.totalorder %s616_s17, 5 }
   0xc   : > { %s693_s25 = scalar_select %p110_p7, %s604_s14, %s112_s21  }
   0xd   : > { %p170_p10 = pnand %p443_p6, %p169_p9 }
   0xe   : > { %p200_p11 = scmp.lt.s32.totalorder (!%p170_p10), %s608_s15, 3  ;;  %v213_v0 = vld [vmem:[%s772_s1] sm:$0xff] (!%p170_p10)  ;;  %vm219_vm0 = vcmask (!%p170_p10), 80896   ;;  %v215_v1 = vld [vmem:[%s772_s1 + $0x10] sm:$0xff] (!%p170_p10)  ;;  %vm232_vm1 = vcmask (!%p170_p10), 1041408   ;;  %vm618_vm2 = vmmov (!%p170_p10), 1  }
   0xf   : > { %173 = sbr.rel (%p170_p10) target bundleno = 282 (0x11a), region = 32  ;;  %468 = vmatprep.mubr.msk.f32.mxu0 (!%p170_p10), %vm219_vm0, %v213_v0  ;;  %471 = vmatprep.mubr.msk.f32.mxu1 (!%p170_p10), %vm219_vm0, %v215_v1  ;;  %vm475_vm3 = vmpackc.low (!%p170_p10), %vm232_vm1, %vm618_vm2  ;;  %v214_v5 = vld [vmem:[%s772_s1 + $0x8] sm:$0xff] (!%p170_p10)  ;;  %v216_v6 = vld [vmem:[%s772_s1 + $0x18] sm:$0xff] (!%p170_p10)  ;;  %s198_s26 = sand.u32 (!%p170_p10), 1, %s600_s13  }
  0x10   : > { %s453_s27 = sshll.u32 (!%p170_p10), %s608_s15, 4  ;;  %s199_s28 = scalar_lea.vmem (!%p170_p10), [#allocation2], %s198_s26 }
  0x11   : > { %s357_s29 = sshll.u32 (!%p170_p10), %s199_s28, 4  ;;  %s724_s5 = scalar_lea.hbm (!%p170_p10), %s774_s3, %s453_s27  ;;  %s726_s29 = int_to_ptr.vmem [resolvable:$true] %s357_s29 }
  0x12   : > { %s344_s6 = scalar_lea.sflag (!%p170_p10), [#allocation3], %s198_s26 }
  0x16   : > { %s201_s30 = scalar_select %p200_p11, %s608_s15, 3 }
  0x17   : > { %s619_s15 = smov [#allocation2]  }
  0x18   : > { %s456_s4 = sshll.u32 %s201_s30, 4  ;;  %s457_s18 = sshll.u32 %s201_s30, 5 }
  0x19   : > { %s207_s7 = scalar_lea.vmem %s771_s0, %s456_s4  ;;  %s212_s23 = scalar_lea.vmem %s773_s2, %s457_s18 }
  0x1a   : > { %v217_v2 = vld [vmem:[%s207_s7] sm:$0xff]  ;;  %v218_v3 = vld [vmem:[%s207_s7 + $0x8] sm:$0x3]  ;;  %v328_v10 = vld [vmem:[%s212_s23 + $0x18] sm:$0xff]  ;;  %s538_s7 = scalar_lea.vmem %s726_s29, 16  ;;  %s542_s8 = sshll.u32 %s619_s15, 4  ;;  %s543_s8 = int_to_ptr.vmem [resolvable:$false] %s542_s8 }
  0x1b   : > { %v474_v4 = vpack.c.bf16 %v218_v3, %v217_v2  ;;  %v326_v8 = vld [vmem:[%s212_s23 + $0x8] sm:$0xff]  ;;  %v325_v13 = vld [vmem:[%s212_s23] sm:$0xff]  ;;  %v327_v16 = vld [vmem:[%s212_s23 + $0x10] sm:$0xff]  ;;  %p539_p12 = scmp.ne.s32.totalorder %s726_s29, %s538_s7  ;;  %s544_s9 = scalar_lea.vmem %s543_s8, 32 }
  0x1c   : > { %p545_p1 = scmp.lt.s32.totalorder %s726_s29, %s543_s8  ;;  %p546_p2 = scmp.lt.s32.totalorder %s544_s9, %s538_s7 }
  0x1d   : > { %476 = vmatprep.subr.msk.bf16.mxu0 %vm475_vm3, %v474_v4  ;;  %480 = vmatprep.subr.msk.bf16.mxu1 %vm475_vm3, %v474_v4  ;;  %p540_p13 = pnand %p539_p12, %p680_p4 }
  0x1e   : > { %479 = vmatpush3.bf16.msk.msra.mxu0 %vm475_vm3, %v474_v4  ;;  %481 = vmatpush3.bf16.msk.msra.mxu1 %vm475_vm3, %v474_v4  ;;  %p547_p3 = por %p546_p2, %p545_p1 }
  0x1f   : > { %p541_p0 = pneg %p540_p13 }
  0x21   : > { %469 = vmatmul.mubr.msk.f32.vlgmr.msra.gmra.mrb[0].mxu0 %vm219_vm0, %v214_v5  ;;  %472 = vmatmul.mubr.msk.f32.vlgmr.msra.gmra.mrb[0].mxu1 %vm219_vm0, %v216_v6  ;;  %p548_p5 = pnand %p547_p3, %p541_p0 }
  0xf4   : > { %v470_v7 = vpop.f32.mrb[0].mxu0  ;;  %v473_v9 = vpop.f32.mrb[0].mxu1 }
  0xf5   : > { %v322_v11 = vmax.f32 %v470_v7, 0.0  ;;  %v302_v12 = vpop.f32.mrb[1].mxu0  ;;  %v324_v14 = vmax.f32 %v473_v9, 0.0  ;;  %v312_v15 = vpop.f32.mrb[1].mxu1 }
  0xf6   : > { %v321_v17 = vmax.f32 %v302_v12, 0.0  ;;  %v323_v18 = vmax.f32 %v312_v15, 0.0 }
  0xf7   : > { %v330_v19 = vmul.f32 %v326_v8, %v322_v11  ;;  %v332_v20 = vmul.f32 %v328_v10, %v324_v14 }
  0xf8   : > { %v329_v21 = vmul.f32 %v325_v13, %v321_v17  ;;  %v331_v22 = vmul.f32 %v327_v16, %v323_v18 }
  0xfa   : > { %v333_v23 = vadd.f32 %v330_v19, %v329_v21 }
  0xfc   : > { %v334_v24 = vadd.f32 %v333_v23, %v331_v22 }
  0xfe   : > { %v335_v25 = vadd.f32 %v334_v24, %v332_v20 }
 0x100   : > { %v336_v26 = vrot.slane %v335_v25, 4 }
 0x102   : > { %v337_v27 = vadd.f32 %v336_v26, %v335_v25 }
 0x104   : > { %v338_v28 = vrot.slane %v337_v27, 2 }
 0x106   : > { %v339_v29 = vadd.f32 %v338_v28, %v337_v27 }
 0x108   : > { %v340_v30 = vrot.slane %v339_v29, 1 }
 0x10a   : > { %v341_v31 = vadd.f32 %v340_v30, %v339_v29 }
 0x10c   : > { %342 = vst [vmem:[%s199_s28] sm:$0x1] %v341_v31 }
 0x10d   : > { %551 = shalt.err (!%p548_p5)
}
 0x10e   : > { %s552_s10 = scalar_lea.hbm %s724_s5, 16  ;;  %s556_s19 = scalar_lea.hbm %s774_s3, 64 }
 0x10f   : > { %p553_p6 = scmp.ne.s32.totalorder %s724_s5, %s552_s10  ;;  %p557_p10 = scmp.lt.u32.totalorder %s724_s5, %s774_s3 }
 0x110   : > { %p558_p11 = scmp.lt.u32.totalorder %s556_s19, %s552_s10  ;;  %p560_p13 = scmp.lt.u32.totalorder %s552_s10, %s724_s5 }
 0x111   : > { %p554_p7 = pnand %p553_p6, %p680_p4 }
 0x112   : > { %p559_p12 = por %p558_p11, %p557_p10 }
 0x113   : > { %p555_p9 = pneg %p554_p7 }
 0x114   : > { %p561_p0 = por %p560_p13, %p559_p12 }
 0x116   : > { %p562_p1 = pnand %p561_p0, %p555_p9 }
 0x118   : > { %565 = shalt.err (!%p562_p1)
}
 0x119   : > { %482 = dma.vmem_to_hbm [thread:$0]  (%p680_p4), %s726_s29, 16, %s724_s5, %s344_s6  }
 0x11a PF: > { %p488_p2 = scmp.ge.s32.totalorder %s616_s17, 2  ;;  %s369_s26 = sand.u32 1, %s596_s12  }
 0x11b   : > { %s370_s27 = scalar_lea.sflag [#allocation3], %s369_s26 }
 0x11c   : > { %p485_p3 = pnand %p488_p2, %p687_p8 }
 0x11e   : > { %591 = dma.done.wait (!%p485_p3), %s370_s27, 16  }
 0x11f   : > { %593 = vsyncadd (!%p485_p3), %s370_s27, 4294967280  ;;  %s16_s17 = sadd.s32 1, %s616_s17   ;;  %s777_s12 = smov %s600_s13 }
 0x120   : > { %p13_p5 = scmp.ge.s32.totalorder %s16_s17, 6   ;;  %s778_s13 = smov %s604_s14 }
 0x121   : > { %s779_s14 = smov %s693_s25  ;;  %s780_s15 = smov %s612_s16 }
 0x122   : > { %s781_s16 = smov %s783_s20  ;;  %15 = sbr.rel (!%p13_p5) target bundleno = 4 (0x4), region = 70 }
 0x129   :  { %374 = vsyncpa [#allocation3], 1 }
 0x12a   :  { %376 = vsyncpa [#allocation3 + $0x1], 1 }

</bundles_post_ra>
